<compile_context>
chip_gen: v7x
topology: tpu7x:2x2x1
jax: 0.10.0
libtpu: 0.0.40
codegen_flags: <defaults>
</compile_context>

<pallas_src>
import math

import jax
import jax.numpy as jnp
from jax import lax
from jax.experimental import pallas as pl
from jax.experimental.pallas import tpu as pltpu

_HALF_LOG_2PI = 0.5 * math.log(2.0 * math.pi)


def _round_up(n, m):
    return ((n + m - 1) // m) * m


def _actor_kernel(x_ref, epsT_ref, w1_ref, b1_ref, w2_ref, b2_ref,
                  w3_ref, b3_ref, whT_ref, bhT_ref, out_ref):
    A = epsT_ref.shape[0]

    # --- MLP trunk: 3 x (Linear + ReLU). bf16 weights/biases, f32 MXU accumulation,
    # bias-add + ReLU in bf16 (2x elements per vreg on v6e/v7x VPU; correct on v5e too).
    h = jnp.dot(x_ref[...].astype(jnp.bfloat16), w1_ref[...],
                preferred_element_type=jnp.float32)
    h = jnp.maximum(h.astype(jnp.bfloat16) + b1_ref[...], 0.0)
    h = jnp.dot(h, w2_ref[...], preferred_element_type=jnp.float32)
    h = jnp.maximum(h.astype(jnp.bfloat16) + b2_ref[...], 0.0)
    h = jnp.dot(h, w3_ref[...], preferred_element_type=jnp.float32)
    h = jnp.maximum(h.astype(jnp.bfloat16) + b3_ref[...], 0.0)          # [TB, 64] bf16

    # --- Fused, transposed mean/std head: [8, 64] x [TB, 64]^T -> [8, TB]
    # (head rows padded to 8 sublanes; rows [0, 2A) are real).  From here on the
    # batch sits in the lane dimension, so the elementwise/transcendental tail and
    # the output stores are lane-dense.
    headT = lax.dot_general(
        whT_ref[...], h,
        dimension_numbers=(((1,), (1,)), ((), ())),
        preferred_element_type=jnp.float32) + bhT_ref[...]              # [8, TB] f32

    mean = headT[:A, :]                 # [A, TB]
    log_std_lin = headT[A:2 * A, :]     # [A, TB]

    # std = softplus(log_std_lin) (numerically stable form), clamped away from 0.
    std = jnp.maximum(log_std_lin, 0.0) + jnp.log1p(jnp.exp(-jnp.abs(log_std_lin)))
    std = jnp.maximum(std, 1e-12)

    # Normal(mean, std).log_prob(mean + std*eps) == -0.5*eps^2 - log(std) - 0.5*log(2*pi)
    eps = epsT_ref[...]                 # [A, TB]
    log_prob_ = -0.5 * eps * eps - jnp.log(std) - _HALF_LOG_2PI

    # action row 0 -> tanh(mean), rows 1.. -> sigmoid(mean); each branch computed
    # only on its own rows (no iota / select, no wasted transcendentals).
    act0 = jnp.tanh(mean[0:1, :])                                       # [1,   TB]
    act1 = jax.nn.sigmoid(mean[1:, :])                                  # [A-1, TB]

    # log_prob = log_prob_ - log(1 - tanh(action)^2 + 1e-7)  (double-squash, matching
    # the reference which applies tanh to the already-squashed action values).
    lp0 = log_prob_[0:1, :] - jnp.log(1.0 - jnp.tanh(act0) ** 2 + 1e-7)
    lp1 = log_prob_[1:, :] - jnp.log(1.0 - jnp.tanh(act1) ** 2 + 1e-7)

    # Packed [2A, TB] output: rows [0, A) = action, rows [A, 2A) = clamp(log_prob, -20, 2).
    out_ref[0:1, :] = act0 * 2.5
    out_ref[1:A, :] = act1 * 0.22
    out_ref[A:A + 1, :] = jnp.clip(lp0, -20.0, 2.0)
    out_ref[A + 1:, :] = jnp.clip(lp1, -20.0, 2.0)


def _choose_batch_tile(B, batch_tile):
    """Pick a batch tile: lane-aligned (mult. of 128), >=2 tiles when worthwhile
    so v7x's 2 TensorCores both get work, and >= ~256 rows to amortize the
    ~0.35us per-grid-step overhead."""
    batch_tile = _round_up(batch_tile, 128)
    if B > batch_tile:
        return batch_tile
    half = _round_up(pl.cdiv(B, 2), 128)
    if half >= 256 and half < B:
        return half
    return B   # single full-batch tile (block == full array dims, always legal)


def actor_net_forward(x, params, eps, *, batch_tile=2048):
    """x: [B, state_dim] f32, eps: [B, action_dim] f32 standard-normal noise.

    Returns (action, log_std) exactly like Actor_net.forward.
    """
    B, S = x.shape
    A = eps.shape[1]
    TB = _choose_batch_tile(B, batch_tile)
    grid = (pl.cdiv(B, TB),)

    eps_t = eps.T      # [A, B]  — trivial relayout done by XLA outside the kernel

    def resident(arr):
        # Whole-array block, constant index -> stays VMEM-resident across grid steps.
        return pl.BlockSpec(arr.shape, lambda i: (0, 0))

    flops = 2 * B * (S * 512 + 512 * 256 + 256 * 64 + 64 * 2 * A)
    weight_bytes = sum(int(p.size) * p.dtype.itemsize for p in params.values())
    cost = pl.CostEstimate(
        flops=flops,
        transcendentals=7 * B * A,
        bytes_accessed=int(x.size) * 4 + int(eps.size) * 4 + B * 2 * A * 4 + weight_bytes,
    )

    packed = pl.pallas_call(
        _actor_kernel,
        out_shape=jax.ShapeDtypeStruct((2 * A, B), jnp.float32),
        grid=grid,
        in_specs=[
            pl.BlockSpec((TB, S), lambda i: (i, 0)),     # x      (batch in sublanes)
            pl.BlockSpec((A, TB), lambda i: (0, i)),     # eps^T  (batch in lanes)
            resident(params["w1"]), resident(params["b1"]),
            resident(params["w2"]), resident(params["b2"]),
            resident(params["w3"]), resident(params["b3"]),
            resident(params["whT"]), resident(params["bhT"]),
        ],
        out_specs=pl.BlockSpec((2 * A, TB), lambda i: (0, i)),   # lane-dense packed out
        compiler_params=pltpu.CompilerParams(
            dimension_semantics=("parallel",),           # megacore-shard batch tiles
            vmem_limit_bytes=32 * 1024 * 1024),
        cost_estimate=cost,
    )(x, eps_t,
      params["w1"], params["b1"],
      params["w2"], params["b2"],
      params["w3"], params["b3"],
      params["whT"], params["bhT"])

    action = packed[:A, :].T
    log_std = packed[A:, :].T
    return action, log_std


def _xavier_uniform(key, fan_in, fan_out):
    bound = math.sqrt(6.0 / (fan_in + fan_out))
    return jax.random.uniform(key, (fan_in, fan_out), jnp.float32, -bound, bound)


def init_params(key, state_dim, action_dim):
    ks = jax.random.split(key, 5)
    wm = _xavier_uniform(ks[3], 64, action_dim)     # mean layer weight [64, A]
    ws = _xavier_uniform(ks[4], 64, action_dim)     # std  layer weight [64, A]
    # Fused + transposed head weight [2A, 64], padded to 8 rows for MXU/sublane alignment.
    whT = jnp.concatenate([wm, ws], axis=1).T       # [2A, 64]
    hp = _round_up(2 * action_dim, 8)
    whT = jnp.pad(whT, ((0, hp - 2 * action_dim), (0, 0)))
    return {
        # bf16 weights & trunk biases halve the weight DMA and VALU traffic; head bias f32.
        "w1": _xavier_uniform(ks[0], state_dim, 512).astype(jnp.bfloat16),
        "b1": jnp.zeros((1, 512), jnp.bfloat16),
        "w2": _xavier_uniform(ks[1], 512, 256).astype(jnp.bfloat16),
        "b2": jnp.zeros((1, 256), jnp.bfloat16),
        "w3": _xavier_uniform(ks[2], 256, 64).astype(jnp.bfloat16),
        "b3": jnp.zeros((1, 64), jnp.bfloat16),
        "whT": whT.astype(jnp.bfloat16),            # [8, 64]
        "bhT": jnp.zeros((hp, 1), jnp.float32),     # [8, 1]
    }


def actor_net_reference(x, params, eps):
    """Pure-JAX reference replicating the kernel's math path (bf16 weights, f32 acc)."""
    def layer(a, w, b):
        acc = jnp.dot(a.astype(jnp.bfloat16), w, preferred_element_type=jnp.float32)
        return jnp.maximum(acc.astype(jnp.bfloat16) + b, 0.0)

    h = layer(x, params["w1"], params["b1"])
    h = layer(h, params["w2"], params["b2"])
    h = layer(h, params["w3"], params["b3"])
    A = eps.shape[1]
    head = (jnp.dot(h, params["whT"].T, preferred_element_type=jnp.float32)
            + params["bhT"].T)[:, :2 * A]
    mean, lsl = head[:, :A], head[:, A:]
    std = jnp.maximum(jnp.maximum(lsl, 0.0) + jnp.log1p(jnp.exp(-jnp.abs(lsl))), 1e-12)
    log_prob_ = -0.5 * eps * eps - jnp.log(std) - _HALF_LOG_2PI
    col = jnp.arange(A)[None, :]
    act_pre = jnp.where(col == 0, jnp.tanh(mean), jax.nn.sigmoid(mean))
    log_prob = log_prob_ - jnp.log(1.0 - jnp.tanh(act_pre) ** 2 + 1e-7)
    action = jnp.where(col == 0, act_pre * 2.5, act_pre * 0.22)
    return action, jnp.clip(log_prob, -20.0, 2.0)


if __name__ == "__main__":
    state_dim, action_dim, batch = 32, 2, 8

    key = jax.random.PRNGKey(0)
    k_params, k_x, k_eps = jax.random.split(key, 3)

    params = init_params(k_params, state_dim, action_dim)
    x = jax.random.normal(k_x, (batch, state_dim), jnp.float32)
    eps = jax.random.normal(k_eps, (batch, action_dim), jnp.float32)

    action, log_std = actor_net_forward(x, params, eps)
    jax.block_until_ready((action, log_std))

    ref_action, ref_log_std = actor_net_reference(x, params, eps)

    assert action.shape == (batch, 2) and log_std.shape == (batch, action_dim)
    assert bool(jnp.all(jnp.isfinite(action))) and bool(jnp.all(jnp.isfinite(log_std)))
    assert bool(jnp.allclose(action, ref_action, rtol=1e-2, atol=1e-2))
    assert bool(jnp.allclose(log_std, ref_log_std, rtol=1e-2, atol=1e-2))
    print("KERNEL_OK")
</pallas_src>

<mosaic_0001>
module attributes {stable_mosaic.version = 11 : i64} {
  func.func @_actor_kernel(%arg0: i32, %arg1: memref<8x32xf32, #tpu.memory_space<vmem>>, %arg2: memref<2x8xf32, #tpu.memory_space<vmem>>, %arg3: memref<32x512xbf16, #tpu.memory_space<vmem>>, %arg4: memref<1x512xbf16, #tpu.memory_space<vmem>>, %arg5: memref<512x256xbf16, #tpu.memory_space<vmem>>, %arg6: memref<1x256xbf16, #tpu.memory_space<vmem>>, %arg7: memref<256x64xbf16, #tpu.memory_space<vmem>>, %arg8: memref<1x64xbf16, #tpu.memory_space<vmem>>, %arg9: memref<8x64xbf16, #tpu.memory_space<vmem>>, %arg10: memref<8x1xf32, #tpu.memory_space<vmem>>, %arg11: memref<4x8xf32, #tpu.memory_space<vmem>>) attributes {dimension_semantics = [#tpu.dimension_semantics<parallel>], iteration_bounds = array<i64: 1>, scalar_prefetch = 0 : i64, scratch_operands = 0 : i64, tpu.core_type = #tpu.core_type<tc>, window_params = [{transform_indices = @transform_0, window_bounds = array<i64: 8, 32>}, {transform_indices = @transform_1, window_bounds = array<i64: 2, 8>}, {pipeline_mode = #tpu.pipeline_mode<synchronous>, transform_indices = @transform_2, window_bounds = array<i64: 32, 512>}, {pipeline_mode = #tpu.pipeline_mode<synchronous>, transform_indices = @transform_3, window_bounds = array<i64: 1, 512>}, {pipeline_mode = #tpu.pipeline_mode<synchronous>, transform_indices = @transform_4, window_bounds = array<i64: 512, 256>}, {pipeline_mode = #tpu.pipeline_mode<synchronous>, transform_indices = @transform_5, window_bounds = array<i64: 1, 256>}, {pipeline_mode = #tpu.pipeline_mode<synchronous>, transform_indices = @transform_6, window_bounds = array<i64: 256, 64>}, {pipeline_mode = #tpu.pipeline_mode<synchronous>, transform_indices = @transform_7, window_bounds = array<i64: 1, 64>}, {pipeline_mode = #tpu.pipeline_mode<synchronous>, transform_indices = @transform_8, window_bounds = array<i64: 8, 64>}, {pipeline_mode = #tpu.pipeline_mode<synchronous>, transform_indices = @transform_9, window_bounds = array<i64: 8, 1>}, {transform_indices = @transform_10, window_bounds = array<i64: 4, 8>}]} {
    %c0 = arith.constant 0 : index
    %c0_0 = arith.constant 0 : index
    %0 = vector.load %arg1[%c0, %c0_0] : memref<8x32xf32, #tpu.memory_space<vmem>>, vector<8x32xf32>
    %1 = arith.truncf %0 : vector<8x32xf32> to vector<8x32xbf16>
    %c0_1 = arith.constant 0 : index
    %c0_2 = arith.constant 0 : index
    %2 = vector.load %arg3[%c0_1, %c0_2] : memref<32x512xbf16, #tpu.memory_space<vmem>>, vector<32x512xbf16>
    %cst = arith.constant dense<0.000000e+00> : vector<8x512xf32>
    %3 = tpu.matmul %1, %2, %cst {dimension_numbers = #tpu.dot_dimension_numbers<[1], [0], [0], [1], [0, 0, 1, 1], [], []>} : vector<8x32xbf16>, vector<32x512xbf16>, vector<8x512xf32> -> vector<8x512xf32>
    %4 = arith.truncf %3 : vector<8x512xf32> to vector<8x512xbf16>
    %c0_3 = arith.constant 0 : index
    %c0_4 = arith.constant 0 : index
    %5 = vector.load %arg4[%c0_3, %c0_4] : memref<1x512xbf16, #tpu.memory_space<vmem>>, vector<1x512xbf16>
    %6 = vector.broadcast %5 : vector<1x512xbf16> to vector<8x512xbf16>
    %7 = arith.addf %4, %6 : vector<8x512xbf16>
    %cst_5 = arith.constant 0.000000e+00 : bf16
    %8 = vector.broadcast %cst_5 : bf16 to vector<8x512xbf16>
    %9 = arith.maximumf %7, %8 : vector<8x512xbf16>
    %c0_6 = arith.constant 0 : index
    %c0_7 = arith.constant 0 : index
    %10 = vector.load %arg5[%c0_6, %c0_7] : memref<512x256xbf16, #tpu.memory_space<vmem>>, vector<512x256xbf16>
    %cst_8 = arith.constant dense<0.000000e+00> : vector<8x256xf32>
    %11 = tpu.matmul %9, %10, %cst_8 {dimension_numbers = #tpu.dot_dimension_numbers<[1], [0], [0], [1], [0, 0, 1, 1], [], []>} : vector<8x512xbf16>, vector<512x256xbf16>, vector<8x256xf32> -> vector<8x256xf32>
    %12 = arith.truncf %11 : vector<8x256xf32> to vector<8x256xbf16>
    %c0_9 = arith.constant 0 : index
    %c0_10 = arith.constant 0 : index
    %13 = vector.load %arg6[%c0_9, %c0_10] : memref<1x256xbf16, #tpu.memory_space<vmem>>, vector<1x256xbf16>
    %14 = vector.broadcast %13 : vector<1x256xbf16> to vector<8x256xbf16>
    %15 = arith.addf %12, %14 : vector<8x256xbf16>
    %cst_11 = arith.constant 0.000000e+00 : bf16
    %16 = vector.broadcast %cst_11 : bf16 to vector<8x256xbf16>
    %17 = arith.maximumf %15, %16 : vector<8x256xbf16>
    %c0_12 = arith.constant 0 : index
    %c0_13 = arith.constant 0 : index
    %18 = vector.load %arg7[%c0_12, %c0_13] : memref<256x64xbf16, #tpu.memory_space<vmem>>, vector<256x64xbf16>
    %cst_14 = arith.constant dense<0.000000e+00> : vector<8x64xf32>
    %19 = tpu.matmul %17, %18, %cst_14 {dimension_numbers = #tpu.dot_dimension_numbers<[1], [0], [0], [1], [0, 0, 1, 1], [], []>} : vector<8x256xbf16>, vector<256x64xbf16>, vector<8x64xf32> -> vector<8x64xf32>
    %20 = arith.truncf %19 : vector<8x64xf32> to vector<8x64xbf16>
    %c0_15 = arith.constant 0 : index
    %c0_16 = arith.constant 0 : index
    %21 = vector.load %arg8[%c0_15, %c0_16] : memref<1x64xbf16, #tpu.memory_space<vmem>>, vector<1x64xbf16>
    %22 = vector.broadcast %21 : vector<1x64xbf16> to vector<8x64xbf16>
    %23 = arith.addf %20, %22 : vector<8x64xbf16>
    %cst_17 = arith.constant 0.000000e+00 : bf16
    %24 = vector.broadcast %cst_17 : bf16 to vector<8x64xbf16>
    %25 = arith.maximumf %23, %24 : vector<8x64xbf16>
    %c0_18 = arith.constant 0 : index
    %c0_19 = arith.constant 0 : index
    %26 = vector.load %arg9[%c0_18, %c0_19] : memref<8x64xbf16, #tpu.memory_space<vmem>>, vector<8x64xbf16>
    %cst_20 = arith.constant dense<0.000000e+00> : vector<8x8xf32>
    %27 = tpu.matmul %26, %25, %cst_20 {dimension_numbers = #tpu.dot_dimension_numbers<[1], [1], [0], [0], [0, 0, 1, 0], [], []>} : vector<8x64xbf16>, vector<8x64xbf16>, vector<8x8xf32> -> vector<8x8xf32>
    %c0_21 = arith.constant 0 : index
    %c0_22 = arith.constant 0 : index
    %28 = vector.load %arg10[%c0_21, %c0_22] : memref<8x1xf32, #tpu.memory_space<vmem>>, vector<8x1xf32>
    %29 = vector.broadcast %28 : vector<8x1xf32> to vector<8x8xf32>
    %30 = arith.addf %27, %29 : vector<8x8xf32>
    %31 = vector.extract_strided_slice %30 {offsets = [0, 0], sizes = [2, 8], strides = [1, 1]} : vector<8x8xf32> to vector<2x8xf32>
    %32 = vector.extract_strided_slice %30 {offsets = [2, 0], sizes = [2, 8], strides = [1, 1]} : vector<8x8xf32> to vector<2x8xf32>
    %cst_23 = arith.constant 0.000000e+00 : f32
    %33 = vector.broadcast %cst_23 : f32 to vector<2x8xf32>
    %34 = arith.maximumf %32, %33 : vector<2x8xf32>
    %35 = math.absf %32 : vector<2x8xf32>
    %cst_24 = arith.constant 0.000000e+00 : f32
    %36 = vector.broadcast %cst_24 : f32 to vector<2x8xf32>
    %37 = arith.subf %36, %35 : vector<2x8xf32>
    %38 = math.exp %37 : vector<2x8xf32>
    %39 = math.log1p %38 : vector<2x8xf32>
    %40 = arith.addf %34, %39 : vector<2x8xf32>
    %cst_25 = arith.constant 9.99999996E-13 : f32
    %41 = vector.broadcast %cst_25 : f32 to vector<2x8xf32>
    %42 = arith.maximumf %40, %41 : vector<2x8xf32>
    %c0_26 = arith.constant 0 : index
    %c0_27 = arith.constant 0 : index
    %43 = vector.load %arg2[%c0_26, %c0_27] : memref<2x8xf32, #tpu.memory_space<vmem>>, vector<2x8xf32>
    %cst_28 = arith.constant -5.000000e-01 : f32
    %44 = vector.broadcast %cst_28 : f32 to vector<2x8xf32>
    %45 = arith.mulf %44, %43 : vector<2x8xf32>
    %46 = arith.mulf %45, %43 : vector<2x8xf32>
    %47 = math.log %42 : vector<2x8xf32>
    %48 = arith.subf %46, %47 : vector<2x8xf32>
    %cst_29 = arith.constant 0.918938517 : f32
    %49 = vector.broadcast %cst_29 : f32 to vector<2x8xf32>
    %50 = arith.subf %48, %49 : vector<2x8xf32>
    %51 = vector.extract_strided_slice %31 {offsets = [0, 0], sizes = [1, 8], strides = [1, 1]} : vector<2x8xf32> to vector<1x8xf32>
    %52 = math.tanh %51 : vector<1x8xf32>
    %53 = vector.extract_strided_slice %31 {offsets = [1, 0], sizes = [1, 8], strides = [1, 1]} : vector<2x8xf32> to vector<1x8xf32>
    %54 = arith.negf %53 : vector<1x8xf32>
    %55 = math.exp %54 : vector<1x8xf32>
    %cst_30 = arith.constant 1.000000e+00 : f32
    %56 = vector.broadcast %cst_30 : f32 to vector<1x8xf32>
    %57 = arith.addf %56, %55 : vector<1x8xf32>
    %58 = arith.divf %56, %57 : vector<1x8xf32>
    %59 = vector.extract_strided_slice %50 {offsets = [0, 0], sizes = [1, 8], strides = [1, 1]} : vector<2x8xf32> to vector<1x8xf32>
    %60 = math.tanh %52 : vector<1x8xf32>
    %61 = arith.mulf %60, %60 : vector<1x8xf32>
    %cst_31 = arith.constant 1.000000e+00 : f32
    %62 = vector.broadcast %cst_31 : f32 to vector<1x8xf32>
    %63 = arith.subf %62, %61 : vector<1x8xf32>
    %cst_32 = arith.constant 1.000000e-07 : f32
    %64 = vector.broadcast %cst_32 : f32 to vector<1x8xf32>
    %65 = arith.addf %63, %64 : vector<1x8xf32>
    %66 = math.log %65 : vector<1x8xf32>
    %67 = arith.subf %59, %66 : vector<1x8xf32>
    %68 = vector.extract_strided_slice %50 {offsets = [1, 0], sizes = [1, 8], strides = [1, 1]} : vector<2x8xf32> to vector<1x8xf32>
    %69 = math.tanh %58 : vector<1x8xf32>
    %70 = arith.mulf %69, %69 : vector<1x8xf32>
    %cst_33 = arith.constant 1.000000e+00 : f32
    %71 = vector.broadcast %cst_33 : f32 to vector<1x8xf32>
    %72 = arith.subf %71, %70 : vector<1x8xf32>
    %cst_34 = arith.constant 1.000000e-07 : f32
    %73 = vector.broadcast %cst_34 : f32 to vector<1x8xf32>
    %74 = arith.addf %72, %73 : vector<1x8xf32>
    %75 = math.log %74 : vector<1x8xf32>
    %76 = arith.subf %68, %75 : vector<1x8xf32>
    %cst_35 = arith.constant 2.500000e+00 : f32
    %77 = vector.broadcast %cst_35 : f32 to vector<1x8xf32>
    %78 = arith.mulf %52, %77 : vector<1x8xf32>
    %c0_36 = arith.constant 0 : index
    %c0_37 = arith.constant 0 : index
    %79 = vector.load %arg11[%c0_36, %c0_37] : memref<4x8xf32, #tpu.memory_space<vmem>>, vector<1x8xf32>
    tpu.vector_store %arg11[%c0_36, %c0_37], %78 {strides = array<i32>} : memref<4x8xf32, #tpu.memory_space<vmem>>, vector<1x8xf32>,
    %cst_38 = arith.constant 2.200000e-01 : f32
    %80 = vector.broadcast %cst_38 : f32 to vector<1x8xf32>
    %81 = arith.mulf %58, %80 : vector<1x8xf32>
    %c1 = arith.constant 1 : index
    %c0_39 = arith.constant 0 : index
    %82 = vector.load %arg11[%c1, %c0_39] : memref<4x8xf32, #tpu.memory_space<vmem>>, vector<1x8xf32>
    tpu.vector_store %arg11[%c1, %c0_39], %81 {strides = array<i32>} : memref<4x8xf32, #tpu.memory_space<vmem>>, vector<1x8xf32>,
    %cst_40 = arith.constant -2.000000e+01 : f32
    %cst_41 = arith.constant 2.000000e+00 : f32
    %83 = vector.broadcast %cst_40 : f32 to vector<1x8xf32>
    %84 = arith.maximumf %83, %67 : vector<1x8xf32>
    %85 = vector.broadcast %cst_41 : f32 to vector<1x8xf32>
    %86 = arith.minimumf %85, %84 : vector<1x8xf32>
    %c2 = arith.constant 2 : index
    %c0_42 = arith.constant 0 : index
    %87 = vector.load %arg11[%c2, %c0_42] : memref<4x8xf32, #tpu.memory_space<vmem>>, vector<1x8xf32>
    tpu.vector_store %arg11[%c2, %c0_42], %86 {strides = array<i32>} : memref<4x8xf32, #tpu.memory_space<vmem>>, vector<1x8xf32>,
    %cst_43 = arith.constant -2.000000e+01 : f32
    %cst_44 = arith.constant 2.000000e+00 : f32
    %88 = vector.broadcast %cst_43 : f32 to vector<1x8xf32>
    %89 = arith.maximumf %88, %76 : vector<1x8xf32>
    %90 = vector.broadcast %cst_44 : f32 to vector<1x8xf32>
    %91 = arith.minimumf %90, %89 : vector<1x8xf32>
    %c3 = arith.constant 3 : index
    %c0_45 = arith.constant 0 : index
    %92 = vector.load %arg11[%c3, %c0_45] : memref<4x8xf32, #tpu.memory_space<vmem>>, vector<1x8xf32>
    tpu.vector_store %arg11[%c3, %c0_45], %91 {strides = array<i32>} : memref<4x8xf32, #tpu.memory_space<vmem>>, vector<1x8xf32>,
    return
  }
  func.func @transform_0(%arg0: i32) -> (i32, i32) {
    %c0_i32 = arith.constant 0 : i32
    %c0_i32_0 = arith.constant 0 : i32
    return %arg0, %c0_i32 : i32, i32
  }
  func.func @transform_1(%arg0: i32) -> (i32, i32) {
    %c0_i32 = arith.constant 0 : i32
    %c0_i32_0 = arith.constant 0 : i32
    return %c0_i32, %arg0 : i32, i32
  }
  func.func @transform_2(%arg0: i32) -> (i32, i32) {
    %c0_i32 = arith.constant 0 : i32
    %c0_i32_0 = arith.constant 0 : i32
    %c0_i32_1 = arith.constant 0 : i32
    return %c0_i32, %c0_i32_0 : i32, i32
  }
  func.func @transform_3(%arg0: i32) -> (i32, i32) {
    %c0_i32 = arith.constant 0 : i32
    %c0_i32_0 = arith.constant 0 : i32
    %c0_i32_1 = arith.constant 0 : i32
    return %c0_i32, %c0_i32_0 : i32, i32
  }
  func.func @transform_4(%arg0: i32) -> (i32, i32) {
    %c0_i32 = arith.constant 0 : i32
    %c0_i32_0 = arith.constant 0 : i32
    %c0_i32_1 = arith.constant 0 : i32
    return %c0_i32, %c0_i32_0 : i32, i32
  }
  func.func @transform_5(%arg0: i32) -> (i32, i32) {
    %c0_i32 = arith.constant 0 : i32
    %c0_i32_0 = arith.constant 0 : i32
    %c0_i32_1 = arith.constant 0 : i32
    return %c0_i32, %c0_i32_0 : i32, i32
  }
  func.func @transform_6(%arg0: i32) -> (i32, i32) {
    %c0_i32 = arith.constant 0 : i32
    %c0_i32_0 = arith.constant 0 : i32
    %c0_i32_1 = arith.constant 0 : i32
    return %c0_i32, %c0_i32_0 : i32, i32
  }
  func.func @transform_7(%arg0: i32) -> (i32, i32) {
    %c0_i32 = arith.constant 0 : i32
    %c0_i32_0 = arith.constant 0 : i32
    %c0_i32_1 = arith.constant 0 : i32
    return %c0_i32, %c0_i32_0 : i32, i32
  }
  func.func @transform_8(%arg0: i32) -> (i32, i32) {
    %c0_i32 = arith.constant 0 : i32
    %c0_i32_0 = arith.constant 0 : i32
    %c0_i32_1 = arith.constant 0 : i32
    return %c0_i32, %c0_i32_0 : i32, i32
  }
  func.func @transform_9(%arg0: i32) -> (i32, i32) {
    %c0_i32 = arith.constant 0 : i32
    %c0_i32_0 = arith.constant 0 : i32
    %c0_i32_1 = arith.constant 0 : i32
    return %c0_i32, %c0_i32_0 : i32, i32
  }
  func.func @transform_10(%arg0: i32) -> (i32, i32) {
    %c0_i32 = arith.constant 0 : i32
    %c0_i32_0 = arith.constant 0 : i32
    return %c0_i32, %arg0 : i32, i32
  }
}

</mosaic_0001>

<bundles_post_ra>
// kernel: tpu_custom_call.1
= control target key start
LH: loop header
LB: loop body
LE: loop exit
PB: predicated region body
PF: predicated region fallthrough
CT: control target
= control target key end

     0   :  { %15 = vsyncpa [#allocation3], 0  ;;  %s1609_s0 = inlined_call_operand.vmem [shape: f32[8,32], index: 0, kind: input, shape index: {}]   ;;  %s1610_s1 = inlined_call_operand.vmem [shape: f32[2,8], index: 1, kind: input, shape index: {}]   ;;  %s1611_s2 = inlined_call_operand.vmem [shape: bf16[32,512], index: 2, kind: input, shape index: {}]   ;;  %s1612_s3 = inlined_call_operand.vmem [shape: bf16[1,512], index: 3, kind: input, shape index: {}]   ;;  %s1613_s4 = inlined_call_operand.hbm [shape: bf16[512,256], index: 4, kind: input, shape index: {}]   ;;  %s1614_s5 = inlined_call_operand.vmem [shape: bf16[1,256], index: 5, kind: input, shape index: {}]   ;;  %s1615_s6 = inlined_call_operand.vmem [shape: bf16[256,64], index: 6, kind: input, shape index: {}]   ;;  %s1616_s7 = inlined_call_operand.vmem [shape: bf16[1,64], index: 7, kind: input, shape index: {}]   ;;  %s1617_s8 = inlined_call_operand.vmem [shape: bf16[8,64], index: 8, kind: input, shape index: {}]   ;;  %s1618_s9 = inlined_call_operand.vmem [shape: f32[8,1], index: 9, kind: input, shape index: {}]   ;;  %s1619_s10 = inlined_call_operand.hbm [shape: f32[4,8], index: 10, kind: output, shape index: {}]  }
   0x1   :  { %16 = vsyncpa [#allocation4], 0  ;;  %s1398_s13 = smov [#allocation2]   ;;  %s1350_s17 = scalar_lea.hbm %s1613_s4, 8192 }
   0x2   :  { %s30_s14 = sshll.u32 %s1398_s13, 4  ;;  %p1351_p0 = scmp.ne.s32.totalorder %s1613_s4, %s1350_s17  ;;  %s31_s14 = int_to_ptr.vmem [resolvable:$true] %s30_s14 }
   0x3   :  { %p1354_p1 = scmp.lt.u32.totalorder %s1350_s17, %s1613_s4 }
   0x5   :  { %p1356_p2 = pnand %p1354_p1, %p1351_p0 }
   0x7   :  { %1359 = shalt.err (!%p1356_p2)
}
   0x8   :  { %s1360_s22 = scalar_lea.vmem %s31_s14, 8192  ;;  %p1365_p4 = scmp.lt.s32.totalorder %s31_s14, %s31_s14 }
   0x9   :  { %p1361_p3 = scmp.ne.s32.totalorder %s31_s14, %s1360_s22  ;;  %p1366_p5 = scmp.lt.s32.totalorder %s1360_s22, %s1360_s22 }
   0xb   :  { %p1367_p6 = por %p1366_p5, %p1365_p4 }
   0xd   :  { %p1368_p7 = pnand %p1367_p6, %p1361_p3 }
   0xf   :  { %1371 = shalt.err (!%p1368_p7)
}
  0x10   :  { %s1399_s23 = smov 128   ;;  %s1400_s24 = smov 8  }
  0x11   :  { %36 = dma.hbm_to_vmem [thread:$0]  %s1613_s4, 8192, %s31_s14, [#allocation3], %s1399_s23, %s1399_s23, %s1400_s24  }
  0x12   :  { %1394 = dma.done.wait [#allocation3], 8192  }
  0x13   :  { %1395 = vsyncadd [#allocation3], 4294959104  ;;  %v1401_v0 = vmov 0   ;;  %v1206_v1 = vld [vmem:[%s1611_s2 + $0x4] ss:$16 sps:$4 sm:$0xff]   ;;  %vm101_vm0 = vcmask 261120  }
  0x14   :  { %137 = vmatprep.mubr.bf16.mxu0 %v1401_v0  ;;  %1205 = vset.pattern.permute.xlu0 %v1401_v0  ;;  %v1208_v2 = vld [vmem:[%s1611_s2] ss:$16 sps:$4 sm:$0xff]   ;;  %v1209_v3 = vld [vmem:[%s1611_s2 + $0x24] ss:$16 sps:$4 sm:$0xff]   ;;  %v1214_v6 = vld [vmem:[%s1611_s2 + $0xc] ss:$16 sps:$4 sm:$0xff]  }
  0x15   :  { %105 = vmatprep.subr.bf16.mxu0 %v1206_v1  ;;  %v1211_v4 = vld [vmem:[%s1611_s2 + $0x20] ss:$16 sps:$4 sm:$0xff]   ;;  %v1212_v7 = vld [vmem:[%s1611_s2 + $0x8] ss:$16 sps:$4 sm:$0xff]   ;;  %v1218_v9 = vld [vmem:[#allocation2 + $0x4] ss:$8 sps:$4 sm:$0xff]  }
  0x16   :  { %106 = vmatpush1.bf16.msra.mxu0 %v1208_v2  ;;  %v51_v5 = vld [vmem:[%s1609_s0] sm:$0xff]  ;;  %v1221_v11 = vld [vmem:[#allocation2 + $0x14] ss:$8 sps:$4 sm:$0xff]   ;;  %637 = vmatprep.subr.bf16.mxu1 %v1218_v9  ;;  %v1223_v13 = vld [vmem:[#allocation2 + $0x10] ss:$8 sps:$4 sm:$0xff]   ;;  %vm1404_vm1 = vmmov 0  }
  0x17   :  { %107 = vmatprep.subr.bf16.mxu0 %v1209_v3  ;;  %v52_v8 = vpack.c.bf16 %v51_v5, %v51_v5  ;;  %v1220_v10 = vld [vmem:[#allocation2] ss:$8 sps:$4 sm:$0xff]   ;;  %v1217_v12 = vld [vmem:[%s1611_s2 + $0x2c] ss:$16 sps:$4 sm:$0xff]   ;;  %v1235_v21 = vld [vmem:[#allocation2 + $0x30] ss:$8 sps:$4 sm:$0xff]  }
  0x18   :  { %638 = vmatpush1.bf16.msra.mxu1 %v1220_v10  ;;  %v1224_v14 = vld [vmem:[#allocation2 + $0x24] ss:$8 sps:$4 sm:$0xff]   ;;  %v1215_v15 = vld [vmem:[%s1611_s2 + $0x28] ss:$16 sps:$4 sm:$0xff]   ;;  %v1230_v18 = vld [vmem:[#allocation2 + $0x34] ss:$8 sps:$4 sm:$0xff]  }
  0x19   :  { %639 = vmatprep.subr.bf16.mxu1 %v1221_v11  ;;  %v1228_v16 = vld [vmem:[#allocation2 + $0x104] ss:$8 sps:$4 sm:$0xff]   ;;  %v1229_v17 = vld [vmem:[#allocation2 + $0x20] ss:$8 sps:$4 sm:$0xff]   ;;  %v1234_v20 = vld [vmem:[#allocation2 + $0x114] ss:$8 sps:$4 sm:$0xff]  }
  0x1a   :  { %108 = vmatpush1.bf16.msra.mxu0 %v1211_v4  ;;  %v1226_v19 = vld [vmem:[#allocation2 + $0x100] ss:$8 sps:$4 sm:$0xff]   ;;  %v1236_v22 = vld [vmem:[#allocation2 + $0x44] ss:$8 sps:$4 sm:$0xff]   ;;  %v1232_v23 = vld [vmem:[#allocation2 + $0x110] ss:$8 sps:$4 sm:$0xff]  }
  0x1b   :  { %146 = vmatprep.subr.bf16.mxu0 %v1214_v6  ;;  %v1240_v24 = vld [vmem:[#allocation2 + $0x124] ss:$8 sps:$4 sm:$0xff]   ;;  %v1241_v25 = vld [vmem:[#allocation2 + $0x40] ss:$8 sps:$4 sm:$0xff]   ;;  %v1242_v26 = vld [vmem:[#allocation2 + $0x54] ss:$8 sps:$4 sm:$0xff]  }
  0x1c   :  { %640 = vmatpush1.bf16.msra.mxu1 %v1223_v13  ;;  %v1238_v27 = vld [vmem:[#allocation2 + $0x120] ss:$8 sps:$4 sm:$0xff]   ;;  %v1246_v28 = vld [vmem:[#allocation2 + $0x134] ss:$8 sps:$4 sm:$0xff]   ;;  %v1247_v29 = vld [vmem:[#allocation2 + $0x50] ss:$8 sps:$4 sm:$0xff]  }
  0x1d   :  { %1078 = vmatmul.mubr.msk.bf16.vlgmr.msra.gmra.mrb[0].mxu0 %vm101_vm0, %v52_v8  ;;  %641 = vmatprep.subr.bf16.mxu1 %v1224_v14  ;;  %v1248_v30 = vld [vmem:[#allocation2 + $0x64] ss:$8 sps:$4 sm:$0xff]   ;;  %v1244_v31 = vld [vmem:[#allocation2 + $0x130] ss:$8 sps:$4 sm:$0xff]   ;;  %v1253_v33 = vld [vmem:[#allocation2 + $0x60] ss:$8 sps:$4 sm:$0xff]  }
  0x1e   :  { %147 = vmatpush1.bf16.msra.mxu0 %v1212_v7  ;;  %178 = vmatprep.mubr.bf16.mxu0 %v1401_v0  ;;  %v1252_v32 = vld [vmem:[#allocation2 + $0x144] ss:$8 sps:$4 sm:$0xff]   ;;  %v1254_v34 = vld [vmem:[#allocation2 + $0x74] ss:$8 sps:$4 sm:$0xff]   ;;  %v1250_v35 = vld [vmem:[#allocation2 + $0x140] ss:$8 sps:$4 sm:$0xff]  }
  0x1f   :  { %148 = vmatprep.subr.bf16.mxu0 %v1217_v12  ;;  %v1258_v36 = vld [vmem:[#allocation2 + $0x154] ss:$8 sps:$4 sm:$0xff]   ;;  %v1259_v37 = vld [vmem:[#allocation2 + $0x70] ss:$8 sps:$4 sm:$0xff]   ;;  %v1260_v38 = vld [vmem:[#allocation2 + $0x84] ss:$8 sps:$4 sm:$0xff]  }
  0x20   :  { %642 = vmatpush1.bf16.msra.mxu1 %v1229_v17  ;;  %v1256_v39 = vld [vmem:[#allocation2 + $0x150] ss:$8 sps:$4 sm:$0xff]   ;;  %v1264_v40 = vld [vmem:[#allocation2 + $0x164] ss:$8 sps:$4 sm:$0xff]   ;;  %v1262_v41 = vld [vmem:[#allocation2 + $0x160] ss:$8 sps:$4 sm:$0xff]  }
  0x21   :  { %643 = vmatprep.subr.bf16.mxu1 %v1230_v18  ;;  %v1265_v42 = vld [vmem:[#allocation2 + $0x80] ss:$8 sps:$4 sm:$0xff]   ;;  %v1266_v43 = vld [vmem:[#allocation2 + $0x94] ss:$8 sps:$4 sm:$0xff]   ;;  %v1271_v45 = vld [vmem:[#allocation2 + $0x90] ss:$8 sps:$4 sm:$0xff]  }
  0x22   :  { %149 = vmatpush1.bf16.msra.mxu0 %v1215_v15  ;;  %v1270_v44 = vld [vmem:[#allocation2 + $0x174] ss:$8 sps:$4 sm:$0xff]   ;;  %v1272_v46 = vld [vmem:[#allocation2 + $0xa4] ss:$8 sps:$4 sm:$0xff]   ;;  %v1268_v47 = vld [vmem:[#allocation2 + $0x170] ss:$8 sps:$4 sm:$0xff]   ;;  %v204_v15 = vlaneseq }
  0x23   :  { %678 = vmatprep.subr.bf16.mxu0 %v1228_v16  ;;  %v1276_v48 = vld [vmem:[#allocation2 + $0x184] ss:$8 sps:$4 sm:$0xff]   ;;  %v1277_v49 = vld [vmem:[#allocation2 + $0xa0] ss:$8 sps:$4 sm:$0xff]   ;;  %v1278_v50 = vld [vmem:[#allocation2 + $0xb4] ss:$8 sps:$4 sm:$0xff]  }
  0x24   :  { %644 = vmatpush1.bf16.msra.mxu1 %v1235_v21  ;;  %v1274_v51 = vld [vmem:[#allocation2 + $0x180] ss:$8 sps:$4 sm:$0xff]   ;;  %v1282_v52 = vld [vmem:[#allocation2 + $0x194] ss:$8 sps:$4 sm:$0xff]   ;;  %v1283_v53 = vld [vmem:[#allocation2 + $0xb0] ss:$8 sps:$4 sm:$0xff]  }
  0x25   :  { %1079 = vmatmul.mubr.msk.bf16.vlgmr.msra.gmra.mrb[4].mxu0 %vm101_vm0, %v52_v8  ;;  %645 = vmatprep.subr.bf16.mxu1 %v1236_v22  ;;  %v1284_v54 = vld [vmem:[#allocation2 + $0xc4] ss:$8 sps:$4 sm:$0xff]   ;;  %v1280_v55 = vld [vmem:[#allocation2 + $0x190] ss:$8 sps:$4 sm:$0xff]   ;;  %v1289_v57 = vld [vmem:[#allocation2 + $0xc0] ss:$8 sps:$4 sm:$0xff]  }
  0x26   :  { %679 = vmatpush1.bf16.msra.mxu0 %v1226_v19  ;;  %v1288_v56 = vld [vmem:[#allocation2 + $0x1a4] ss:$8 sps:$4 sm:$0xff]   ;;  %v1290_v58 = vld [vmem:[#allocation2 + $0xd4] ss:$8 sps:$4 sm:$0xff]   ;;  %v1286_v59 = vld [vmem:[#allocation2 + $0x1a0] ss:$8 sps:$4 sm:$0xff]  }
  0x27   :  { %680 = vmatprep.subr.bf16.mxu0 %v1234_v20  ;;  %v1294_v60 = vld [vmem:[#allocation2 + $0x1b4] ss:$8 sps:$4 sm:$0xff]   ;;  %v1295_v61 = vld [vmem:[#allocation2 + $0xd0] ss:$8 sps:$4 sm:$0xff]   ;;  %v1296_v63 = vld [vmem:[#allocation2 + $0xe4] ss:$8 sps:$4 sm:$0xff]  }
  0x28   :  { %646 = vmatpush1.bf16.msra.mxu1 %v1241_v25  ;;  %v1292_v62 = vld [vmem:[#allocation2 + $0x1b0] ss:$8 sps:$4 sm:$0xff]   ;;  %v1300_v1 = vld [vmem:[#allocation2 + $0x1c4] ss:$8 sps:$4 sm:$0xff]   ;;  %v1298_v2 = vld [vmem:[#allocation2 + $0x1c0] ss:$8 sps:$4 sm:$0xff]  }
  0x29   :  { %647 = vmatprep.subr.bf16.mxu1 %v1242_v26  ;;  %v1301_v3 = vld [vmem:[#allocation2 + $0xe0] ss:$8 sps:$4 sm:$0xff]   ;;  %v1302_v4 = vld [vmem:[#allocation2 + $0xf4] ss:$8 sps:$4 sm:$0xff]   ;;  %v1304_v5 = vld [vmem:[#allocation2 + $0x1d0] ss:$8 sps:$4 sm:$0xff]  }
  0x2a   :  { %681 = vmatpush1.bf16.msra.mxu0 %v1232_v23  ;;  %v1306_v6 = vld [vmem:[#allocation2 + $0x1d4] ss:$8 sps:$4 sm:$0xff]   ;;  %v1307_v7 = vld [vmem:[#allocation2 + $0xf0] ss:$8 sps:$4 sm:$0xff]   ;;  %v1310_v8 = vld [vmem:[#allocation2 + $0x1e4] ss:$8 sps:$4 sm:$0xff]  }
  0x2b   :  { %682 = vmatprep.subr.bf16.mxu0 %v1240_v24  ;;  %v1308_v9 = vld [vmem:[#allocation2 + $0x1e0] ss:$8 sps:$4 sm:$0xff]   ;;  %v1313_v10 = vld [vmem:[#allocation2 + $0x1f4] ss:$8 sps:$4 sm:$0xff]   ;;  %v1311_v11 = vld [vmem:[#allocation2 + $0x1f0] ss:$8 sps:$4 sm:$0xff]  }
  0x2c   :  { %648 = vmatpush1.bf16.msra.mxu1 %v1247_v29  ;;  %v1314_v12 = vld [vmem:[%s1615_s6 + $0x40] sm:$0xff]   ;;  %v1402_v13 = vmov 1966171168   ;;  %v205_v17 = vshrl.u32 %v204_v15, 7  ;;  %vm949_vm2 = vcmask 523264   ;;  %vm1044_vm3 = vcmask 57344  }
  0x2d   :  { %649 = vmatprep.subr.bf16.mxu1 %v1248_v30  ;;  %v202_v14 = vunpack.c.l.s4 %v1402_v13  ;;  %v1080_v18 = vld.sshfl [vmem:[%s1612_s3] sm:$0x33 pattern:$0x75316420]  ;;  %vm1047_vm4 = vcmask 58369   ;;  %s1405_s15 = smov [#allocation5]  }
  0x2e   :  { %683 = vmatpush1.bf16.msra.mxu0 %v1238_v27  ;;  %v200_v20 = vcombine.high %v1080_v18, %v1080_v18  ;;  %v1515_v24 = vsub.s32 0, %v205_v17  ;;  %s1061_s16 = sshll.u32 %s1405_s15, 4  ;;  %s1062_s16 = int_to_ptr.vmem [resolvable:$true] %s1061_s16 }
  0x2f   :  { %684 = vmatprep.subr.bf16.mxu0 %v1246_v28  ;;  %v203_v16 = vunpack.c.0.s8 %v202_v14  ;;  %p1377_p9 = scmp.lt.s32.totalorder %s1062_s16, %s1062_s16 }
  0x30   :  { %650 = vmatpush1.bf16.msra.mxu1 %v1253_v33 }
  0x31   :  { %651 = vmatprep.subr.bf16.mxu1 %v1254_v34  ;;  %v1511_v19 = vsub.s32 %v203_v16, %v205_v17 }
  0x32   :  { %685 = vmatpush1.bf16.msra.mxu0 %v1244_v31 }
  0x33   :  { %686 = vmatprep.subr.bf16.mxu0 %v1252_v32  ;;  %v207_v21 = vrot.slane %v1080_v18, %v1511_v19  ;;  %v214_v22 = vrot.slane %v200_v20, %v1511_v19 }
  0x34   :  { %652 = vmatpush1.bf16.msra.mxu1 %v1259_v37 }
  0x35   :  { %653 = vmatprep.subr.bf16.mxu1 %v1260_v38  ;;  %v218_v23 = vpack.i.b16 %v207_v21, %v207_v21  ;;  %v225_v25 = vpack.i.b16 %v214_v22, %v214_v22  ;;  %v215_v27 = vcombine.high %v207_v21, %v207_v21  ;;  %v216_v30 = vcombine.high %v214_v22, %v214_v22 }
  0x36   :  { %687 = vmatpush1.bf16.msra.mxu0 %v1250_v35 }
  0x37   :  { %688 = vmatprep.subr.bf16.mxu0 %v1258_v36  ;;  %v223_v26 = vrot.slane %v218_v23, %v1515_v24  ;;  %v230_v29 = vrot.slane %v225_v25, %v1515_v24  ;;  %v232_v37 = vpack.i.b16 %v215_v27, %v215_v27 }
  0x38   :  { %654 = vmatpush1.bf16.msra.mxu1 %v1265_v42 }
  0x39   :  { %655 = vmatprep.subr.bf16.mxu1 %v1266_v43  ;;  %v237_v42 = vrot.slane %v232_v37, %v1515_v24 }
  0x3a   :  { %689 = vmatpush1.bf16.msra.mxu0 %v1256_v39  ;;  %v239_v39 = vpack.i.b16 %v216_v30, %v216_v30 }
  0x3b   :  { %690 = vmatprep.subr.bf16.mxu0 %v1264_v40 }
  0x3c   :  { %656 = vmatpush1.bf16.msra.mxu1 %v1271_v45 }
  0x3d   :  { %657 = vmatprep.subr.bf16.mxu1 %v1272_v46  ;;  %v244_v46 = vrot.slane %v239_v39, %v1515_v24 }
  0x3e   :  { %691 = vmatpush1.bf16.msra.mxu0 %v1262_v41  ;;  %v1315_v41 = vld [vmem:[%s1615_s6] sm:$0xff]  }
  0x3f   :  { %692 = vmatprep.subr.bf16.mxu0 %v1270_v44  ;;  %v1316_v44 = vld [vmem:[%s1615_s6 + $0x48] sm:$0xff]  }
  0x40   :  { %658 = vmatpush1.bf16.msra.mxu1 %v1277_v49 }
  0x41   :  { %659 = vmatprep.subr.bf16.mxu1 %v1278_v50 }
  0x42   :  { %693 = vmatpush1.bf16.msra.mxu0 %v1268_v47 }
  0x43   :  { %694 = vmatprep.subr.bf16.mxu0 %v1276_v48 }
  0x44   :  { %660 = vmatpush1.bf16.msra.mxu1 %v1283_v53 }
  0x45   :  { %661 = vmatprep.subr.bf16.mxu1 %v1284_v54  ;;  %v1318_v54 = vld [vmem:[%s1615_s6 + $0x50] sm:$0xff]  }
  0x46   :  { %695 = vmatpush1.bf16.msra.mxu0 %v1274_v51  ;;  %v1317_v51 = vld [vmem:[%s1615_s6 + $0x8] sm:$0xff]  }
  0x47   :  { %696 = vmatprep.subr.bf16.mxu0 %v1282_v52 }
  0x48   :  { %662 = vmatpush1.bf16.msra.mxu1 %v1289_v57  ;;  %v1319_v57 = vld [vmem:[%s1615_s6 + $0x10] sm:$0xff]  }
  0x49   :  { %663 = vmatprep.subr.bf16.mxu1 %v1290_v58 }
  0x4a   :  { %697 = vmatpush1.bf16.msra.mxu0 %v1280_v55 }
  0x4b   :  { %698 = vmatprep.subr.bf16.mxu0 %v1288_v56 }
  0x4c   :  { %664 = vmatpush1.bf16.msra.mxu1 %v1295_v61  ;;  %v1322_v61 = vld [vmem:[%s1615_s6 + $0x60] sm:$0xff]  }
  0x4d   :  { %665 = vmatprep.subr.bf16.mxu1 %v1296_v63  ;;  %v1324_v63 = vld [vmem:[%s1615_s6 + $0x68] sm:$0xff]  }
  0x4e   :  { %699 = vmatpush1.bf16.msra.mxu0 %v1286_v59  ;;  %v1320_v59 = vld [vmem:[%s1615_s6 + $0x58] sm:$0xff]  }
  0x4f   :  { %700 = vmatprep.subr.bf16.mxu0 %v1294_v60  ;;  %v1321_v60 = vld [vmem:[%s1615_s6 + $0x18] sm:$0xff]  }
  0x50   :  { %666 = vmatpush1.bf16.msra.mxu1 %v1301_v3  ;;  %v1327_v3 = vld [vmem:[%s1615_s6 + $0x30] sm:$0xff]  }
  0x51   :  { %667 = vmatprep.subr.bf16.mxu1 %v1302_v4  ;;  %v1328_v4 = vld [vmem:[%s1615_s6 + $0x78] sm:$0xff]  }
  0x52   :  { %701 = vmatpush1.bf16.msra.mxu0 %v1292_v62  ;;  %v1323_v62 = vld [vmem:[%s1615_s6 + $0x20] sm:$0xff]  }
  0x53   :  { %702 = vmatprep.subr.bf16.mxu0 %v1300_v1  ;;  %v1325_v1 = vld [vmem:[%s1615_s6 + $0x28] sm:$0xff]  }
  0x54   :  { %668 = vmatpush1.bf16.msra.mxu1 %v1307_v7 }
  0x55   :  { %1165 = vmatprep.subr.bf16.mxu1 %v1314_v12 }
  0x56   :  { %703 = vmatpush1.bf16.msra.mxu0 %v1298_v2  ;;  %v1326_v2 = vld [vmem:[%s1615_s6 + $0x70] sm:$0xff]  }
  0x57   :  { %704 = vmatprep.subr.bf16.mxu0 %v1306_v6  ;;  %v1145_v6 = vld.sshfl [vmem:[%s1614_s5] sm:$0x11 pattern:$0x75316420] }
  0x58   :  { %v730_v7 = vcombine.high %v1145_v6, %v1145_v6 }
  0x5a   :  { %705 = vmatpush1.bf16.msra.mxu0 %v1304_v5  ;;  %v1329_v5 = vld [vmem:[%s1615_s6 + $0x38] sm:$0xff]   ;;  %v744_v12 = vrot.slane %v730_v7, %v1511_v19 }
  0x5b   :  { %706 = vmatprep.subr.bf16.mxu0 %v1310_v8 }
  0x5c   :  { %v753_v15 = vpack.i.b16 %v744_v12, %v744_v12 }
  0x5e   :  { %707 = vmatpush1.bf16.msra.mxu0 %v1308_v9  ;;  %v758_v22 = vrot.slane %v753_v15, %v1515_v24 }
  0x5f   :  { %708 = vmatprep.subr.bf16.mxu0 %v1313_v10  ;;  %v737_v10 = vrot.slane %v1145_v6, %v1511_v19 }
  0x61   :  { %v746_v14 = vpack.i.b16 %v737_v10, %v737_v10 }
  0x62   :  { %709 = vmatpush1.bf16.msra.mxu0 %v1311_v11 }
  0x63   :  { %v751_v18 = vrot.slane %v746_v14, %v1515_v24 }
  0xf0   :  { %v139_v28 = vpop.f32.mrb[0].mxu0 }
  0xf1   :  { %v187_v31 = vpack.c.bf16 %v139_v28, %v139_v28  ;;  %v141_v32 = vpop.f32.mrb[1].mxu0 }
  0xf2   :  { %v188_v33 = vpack.c.bf16 %v141_v32, %v141_v32  ;;  %v143_v34 = vpop.f32.mrb[2].mxu0  ;;  %v943_v32 = vld [vmem:[%s1618_s9] sm:$0xff] }
  0xf3   :  { %v245_v35 = vadd.bf16 %v223_v26, %v187_v31  ;;  %v144_v36 = vpop.f32.mrb[3].mxu0  ;;  %v1403_v31 = vmov 0.0   ;;  %946 = vperm.xlu0 %1205, %v943_v32  }
  0xf4   :  { %v246_v38 = vadd.bf16 %v230_v29, %v188_v33  ;;  %1189 = vmatprep.subr.bf16.mxu0 %v1403_v31  ;;  %v932_v33 = vld [vmem:[%s1616_s7] sm:$0x1] }
  0xf5   :  { %v249_v43 = vmax.bf16 %v1401_v0, %v245_v35  ;;  %v934_v34 = vpack.i.b16 %v932_v33, %v932_v33 }
  0xf6   :  { %v250_v40 = vmax.bf16 %v1401_v0, %v246_v38 }
  0xf7   :  { %v939_v38 = vrot.slane %v934_v34, %v1515_v24 }
  0xf8   :  { %v180_v45 = vpop.f32.mrb[4].mxu0  ;;  %669 = vmatprep.mubr.bf16.mxu1 %v250_v40 }
  0xf9   :  { %v189_v47 = vpack.c.bf16 %v180_v45, %v180_v45  ;;  %v182_v48 = vpop.f32.mrb[5].mxu0  ;;  %670 = vmatmul.mubr.bf16.vlgmr.msra.gmra.mrb[0].mxu1 %v249_v43  ;;  %v942_v45 = vld [vmem:[%s1617_s8] sm:$0xf] }
  0xfa   :  { %v190_v49 = vpack.c.bf16 %v182_v48, %v182_v48  ;;  %v184_v50 = vpop.f32.mrb[6].mxu0  ;;  %1166 = vmatpush3.bf16.msra.mxu1 %v1315_v41 }
  0xfb   :  { %v247_v52 = vadd.bf16 %v237_v42, %v189_v47  ;;  %v185_v53 = vpop.f32.mrb[7].mxu0  ;;  %1167 = vmatprep.subr.bf16.mxu1 %v1316_v44 }
  0xfc   :  { %v248_v55 = vadd.bf16 %v244_v46, %v190_v49 }
  0xfd   :  { %v251_v58 = vmax.bf16 %v1401_v0, %v247_v52 }
  0xfe   :  { %v252_v56 = vmax.bf16 %v1401_v0, %v248_v55  ;;  %1168 = vmatpush3.bf16.msra.mxu1 %v1317_v51 }
  0xff   :  { %1169 = vmatprep.subr.bf16.mxu1 %v1318_v54 }
 0x100   :  { %710 = vmatprep.mubr.bf16.mxu0 %v252_v56 }
 0x101   :  { %711 = vmatmul.mubr.bf16.vlgmr.msra.gmra.mrb[8].mxu0 %v251_v58 }
 0x102   :  { %1170 = vmatpush3.bf16.msra.mxu1 %v1319_v57  ;;  %1191 = vmatprep.mubr.msk.bf16.mxu0 %vm1404_vm1, %v1403_v31 }
 0x103   :  { %1171 = vmatprep.subr.bf16.mxu1 %v1320_v59 }
 0x106   :  { %1172 = vmatpush3.bf16.msra.mxu1 %v1321_v60 }
 0x107   :  { %1173 = vmatprep.subr.bf16.mxu1 %v1322_v61 }
 0x10a   :  { %1174 = vmatpush3.bf16.msra.mxu1 %v1323_v62 }
 0x10b   :  { %1175 = vmatprep.subr.bf16.mxu1 %v1324_v63 }
 0x10e   :  { %1176 = vmatpush3.bf16.msra.mxu1 %v1325_v1 }
 0x10f   :  { %1177 = vmatprep.subr.bf16.mxu1 %v1326_v2 }
 0x112   :  { %1178 = vmatpush3.bf16.msra.mxu1 %v1327_v3 }
 0x113   :  { %1179 = vmatprep.subr.bf16.mxu1 %v1328_v4 }
 0x116   :  { %1180 = vmatpush3.bf16.msra.mxu1 %v1329_v5 }
 0x172   :  { %v947_v46 = vpop.permute.xlu0 %946 }
 0x1cc   :  { %v671_v8 = vpop.f32.mrb[0].mxu1 }
 0x1cd   :  { %v673_v9 = vpop.f32.mrb[1].mxu1 }
 0x1ce   :  { %v675_v11 = vpop.f32.mrb[2].mxu1 }
 0x1cf   :  { %v676_v13 = vpop.f32.mrb[3].mxu1 }
 0x1d4   :  { %v712_v16 = vpop.f32.mrb[8].mxu0 }
 0x1d5   :  { %v713_v17 = vadd.f32 %v712_v16, %v671_v8  ;;  %v714_v20 = vpop.f32.mrb[9].mxu0  ;;  %v1012_v16 = vld [vmem:[%s1610_s1] sm:$0x3]  ;;  %s1372_s1 = scalar_lea.vmem %s1062_s16, 64 }
 0x1d6   :  { %v715_v21 = vadd.f32 %v714_v20, %v673_v9  ;;  %v716_v23 = vpop.f32.mrb[10].mxu0  ;;  %p1373_p8 = scmp.ne.s32.totalorder %s1062_s16, %s1372_s1  ;;  %p1378_p10 = scmp.lt.s32.totalorder %s1372_s1, %s1372_s1 }
 0x1d7   :  { %v719_v25 = vpack.c.bf16 %v713_v17, %v713_v17  ;;  %v717_v26 = vpop.f32.mrb[11].mxu0 }
 0x1d8   :  { %v720_v27 = vpack.c.bf16 %v715_v21, %v715_v21  ;;  %p1379_p11 = por %p1378_p10, %p1377_p9 }
 0x1d9   :  { %v759_v28 = vadd.bf16 %v751_v18, %v719_v25  ;;  %v1013_v18 = vmul.f32 -0.5, %v1012_v16 }
 0x1da   :  { %v760_v29 = vadd.bf16 %v758_v22, %v720_v27  ;;  %p1380_p12 = pnand %p1379_p11, %p1373_p8 }
 0x1db   :  { %v761_v19 = vmax.bf16 %v1401_v0, %v759_v28  ;;  %v1014_v22 = vmul.f32 %v1013_v18, %v1012_v16 }
 0x1dc   :  { %v762_v30 = vmax.bf16 %v1401_v0, %v760_v29 }
 0x1de   :  { %923 = vmatprep.mubr.bf16.mxu1 %v762_v30 }
 0x1df   :  { %924 = vmatmul.mubr.bf16.vlgmr.msra.gmra.mrb[4].mxu1 %v761_v19 }
 0x2b2   :  { %v1181_v35 = vpop.f32.mrb[4].mxu1 }
 0x2b3   :  { %v1182_v36 = vpop.f32.mrb[5].mxu1 }
 0x2b4   :  { %v1183_v37 = vadd.f32 %v1182_v36, %v1181_v35  ;;  %v1184_v39 = vpop.f32.mrb[6].mxu1 }
 0x2b5   :  { %v1185_v40 = vpop.f32.mrb[7].mxu1 }
 0x2b6   :  { %v931_v41 = vpack.c.bf16 %v1183_v37, %v1183_v37 }
 0x2b8   :  { %v940_v42 = vadd.bf16 %v939_v38, %v931_v41 }
 0x2ba   :  { %v941_v43 = vmax.bf16 %v1401_v0, %v940_v42 }
 0x2bc   :  { %v954_v44 = vsel %vm949_vm2, %v941_v43, 0 }
 0x2bd   :  { %1190 = vmatpush3.bf16.xpose.msra.mxu0 %v954_v44 }
 0x2c4   :  { %1192 = vmatmul.mubr.msk.bf16.vlgmr.msra.gmra.mrb[12].mxu0 %vm949_vm2, %v942_v45 }
 0x397   :  { %v990_v47 = vpop.f32.mrb[12].mxu0 }
 0x398   :  { %v991_v48 = vadd.f32 %v990_v47, %v947_v46  ;;  %v1193_v49 = vpop.f32.mrb[13].mxu0 }
 0x399   :  { %v993_v50 = vpop.f32.mrb[14].mxu0 }
 0x39a   :  { %v997_v24 = vand.u32 2147483647, %v991_v48  ;;  %1330 = vtanh.f32 %v991_v48  ;;  %v1164_v51 = vmul.f32 -1.442695, %v991_v48  ;;  %v1194_v52 = vpop.f32.mrb[15].mxu0  ;;  %v996_v7 = vmax.f32 %v991_v48, 0.0 }
 0x39c   :  { %v998_v53 = vsub.f32 0.0, %v997_v24  ;;  %1332 = vpow2.f32 %v1164_v51 }
 0x39e   :  { %v999_v54 = vmul.f32 1.442695, %v998_v53 }
 0x3a0   :  { %1334 = vpow2.f32 %v999_v54 }
 0x3a4   :  { %v1331_v0 = vpop.eup %1330 }
 0x3a5   :  { %v1043_v55 = vmul.f32 2.5, %v1331_v0 }
 0x3a6   :  { %v1333_v56 = vpop.eup %1332 }
 0x3a7   :  { %v1026_v57 = vadd.f32 1.0, %v1333_v56  ;;  %1045 = vst.msk [vmem:[#allocation5] sm:$0x1] %vm1044_vm3, %v1043_v55 }
 0x3a9   :  { %1336 = vrcp.f32 %v1026_v57 }
 0x3aa   :  { %v1335_v58 = vpop.eup %1334  ;;  %1338 = vtanh.f32 %v1331_v0 }
 0x3ab   :  { %v1001_v59 = vadd.f32 1.0, %v1335_v58  ;;  %v1004_v60 = vmul.f32 -0.5, %v1335_v58  ;;  %v1007_v2 = vand.u32 2147483647, %v1335_v58 }
 0x3ad   :  { %1340 = vlog2.f32 %v1001_v59  ;;  %v1005_v63 = vadd.f32 1.0, %v1004_v60  ;;  %vm1008_vm5 = vcmp.lt.f32.partialorder %v1007_v2, 0.0004427343 }
 0x3af   :  { %v1006_v6 = vmul.f32 %v1335_v58, %v1005_v63 }
 0x3b3   :  { %v1337_v61 = vpop.eup %1336 }
 0x3b4   :  { %v1339_v62 = vpop.eup %1338  ;;  %1342 = vtanh.f32 %v1337_v61  ;;  %v1046_v1 = vmul.f32 0.22, %v1337_v61 }
 0x3b5   :  { %v1030_v4 = vmul.f32 %v1339_v62, %v1339_v62 }
 0x3b6   :  { %1048 = vst.msk [vmem:[#allocation5] sm:$0x2] %vm1047_vm4, %v1046_v1 }
 0x3b7   :  { %v1341_v3 = vpop.eup %1340  ;;  %v1031_v10 = vsub.f32 1.0, %v1030_v4 }
 0x3b8   :  { %v1003_v5 = vmul.f32 0.6931472, %v1341_v3 }
 0x3b9   :  { %v1032_v13 = vadd.f32 1e-07, %v1031_v10 }
 0x3ba   :  { %v1009_v8 = vsel %vm1008_vm5, %v1006_v6, %v1003_v5 }
 0x3bb   :  { %v1010_v9 = vadd.f32 %v1009_v8, %v996_v7 }
 0x3bd   :  { %v1011_v11 = vmax.f32 %v1010_v9, 1e-12 }
 0x3be   :  { %v1343_v12 = vpop.eup %1342 }
 0x3bf   :  { %1344 = vlog2.f32 %v1011_v11  ;;  %v1037_v14 = vmul.f32 %v1343_v12, %v1343_v12 }
 0x3c0   :  { %1346 = vlog2.f32 %v1032_v13 }
 0x3c1   :  { %v1038_v15 = vsub.f32 1.0, %v1037_v14 }
 0x3c3   :  { %v1039_v17 = vadd.f32 1e-07, %v1038_v15 }
 0x3c5   :  { %1348 = vlog2.f32 %v1039_v17 }
 0x3c9   :  { %v1345_v20 = vpop.eup %1344 }
 0x3ca   :  { %v1016_v21 = vmul.f32 0.6931472, %v1345_v20  ;;  %v1347_v25 = vpop.eup %1346 }
 0x3cb   :  { %v1034_v29 = vmul.f32 0.6931472, %v1347_v25 }
 0x3cc   :  { %v1018_v23 = vrot.slane %v1016_v21, 2 }
 0x3ce   :  { %v1020_v26 = vsub.f32 %v1014_v22, %v1018_v23 }
 0x3cf   :  { %v1349_v27 = vpop.eup %1348 }
 0x3d0   :  { %v1163_v28 = vadd.f32 -0.9189385, %v1020_v26  ;;  %v1041_v30 = vmul.f32 0.6931472, %v1349_v27 }
 0x3d2   :  { %v1035_v19 = vsub.f32 %v1163_v28, %v1034_v29  ;;  %v1042_v31 = vsub.f32 %v1163_v28, %v1041_v30 }
 0x3d4   :  { %v1049_v32 = vmax.f32 %v1035_v19, -20.0  ;;  %v1052_v33 = vmax.f32 %v1042_v31, -20.0 }
 0x3d6   :  { %v1050_v34 = vmin.f32 %v1049_v32, 2.0  ;;  %v1053_v35 = vmin.f32 %v1052_v33, 2.0 }
 0x3d8   :  { %1051 = vst.msk [vmem:[#allocation5 + $0x2] sm:$0x1] %vm1044_vm3, %v1050_v34 }
 0x3d9   :  { %1054 = vst.msk [vmem:[#allocation5 + $0x2] sm:$0x2] %vm1047_vm4, %v1053_v35 }
 0x3da   :  { %1383 = shalt.err (!%p1380_p12)
}
 0x3db   :  { %s1384_s19 = scalar_lea.hbm %s1619_s10, 64 }
 0x3dc   :  { %p1385_p13 = scmp.ne.s32.totalorder %s1619_s10, %s1384_s19  ;;  %p1388_p0 = scmp.lt.u32.totalorder %s1384_s19, %s1619_s10 }
 0x3de   :  { %p1390_p1 = pnand %p1388_p0, %p1385_p13 }
 0x3e0   :  { %1393 = shalt.err (!%p1390_p1)
}
 0x3e1   :  { %1064 = dma.vmem_to_hbm [thread:$0]  %s1062_s16, 64, %s1619_s10, [#allocation4]  }
 0x3e2   :  { %1396 = dma.done.wait [#allocation4], 64  }
 0x3e3   :  { %1397 = vsyncadd [#allocation4], 4294967232 }
 0x3e4   :  { %1068 = vsyncpa [#allocation3], 1 }
 0x3e5   :  { %1069 = vsyncpa [#allocation4], 1 }

</bundles_post_ra>
